<compile_context>
chip_gen: v5e
topology: v5e:2x2
jax: 0.10.0
libtpu: 0.0.40
codegen_flags: <defaults>
</compile_context>

<pallas_src>
import functools

import jax
import jax.numpy as jnp
from jax.experimental import pallas as pl
from jax.experimental.pallas import tpu as pltpu


_LANES = 128
_SUBLANES = 8
# ~2 MiB per tile buffer: in+out, double-buffered = 8 MiB live.
_TILE_BYTES_TARGET = 2 * 1024 * 1024


def _sin_kernel(x_ref, o_ref):
    # Elementwise sine on the current VMEM tile (EUP transcendental path).
    x = x_ref[...]
    if x.dtype != jnp.float32:
        x = x.astype(jnp.float32)
    o_ref[...] = jnp.sin(x).astype(o_ref.dtype)


def _choose_lane_width(n: int) -> int:
    """Pick the last-dim width of the 2D slab.

    Wider lane-dense last dims give unmasked full-width vector stores; only
    widen when the extra padding it could require stays under ~6% of the work.
    """
    for lane_width in (4096, 2048, 1024, 512, 256):
        chunk = _SUBLANES * lane_width
        if n >= 16 * chunk:
            return lane_width
    return _LANES


@jax.jit
def sin_pallas(x: jax.Array) -> jax.Array:
    """Compute sin(x) elementwise with a Pallas TPU kernel (any shape/float dtype)."""
    orig_shape = x.shape
    orig_dtype = x.dtype

    flat = x.reshape(-1)
    n = flat.shape[0]
    if n == 0:
        return x

    lane_width = _choose_lane_width(n)
    chunk = _SUBLANES * lane_width
    n_pad = (-n) % chunk
    if n_pad:
        flat = jnp.pad(flat, (0, n_pad))
    rows = flat.shape[0] // lane_width
    x2d = flat.reshape(rows, lane_width)

    # Tile rows targeting ~2 MiB per buffer; multiple of 8 sublanes; clamp to extent.
    itemsize = jnp.dtype(orig_dtype).itemsize
    tile_rows = max(_SUBLANES, _TILE_BYTES_TARGET // (lane_width * itemsize))
    tile_rows = (tile_rows // _SUBLANES) * _SUBLANES
    tile_rows = min(tile_rows, rows)

    grid = (pl.cdiv(rows, tile_rows),)

    out2d = pl.pallas_call(
        _sin_kernel,
        out_shape=jax.ShapeDtypeStruct((rows, lane_width), orig_dtype),
        grid_spec=pltpu.PrefetchScalarGridSpec(
            num_scalar_prefetch=0,
            grid=grid,
            in_specs=[pl.BlockSpec((tile_rows, lane_width), lambda i: (i, 0))],
            out_specs=pl.BlockSpec((tile_rows, lane_width), lambda i: (i, 0)),
        ),
        compiler_params=pltpu.CompilerParams(
            dimension_semantics=("parallel",),
        ),
        cost_estimate=pl.CostEstimate(
            flops=0,
            transcendentals=rows * lane_width,
            bytes_accessed=2 * rows * lane_width * itemsize,
        ),
    )(x2d)

    out_flat = out2d.reshape(-1)
    if n_pad:
        out_flat = out_flat[:n]
    return out_flat.reshape(orig_shape)


if __name__ == "__main__":
    key = jax.random.PRNGKey(0)
    # NCHW input, matching a typical PyTorch conv-net tensor.
    x = jax.random.normal(key, (2, 4, 16, 16), dtype=jnp.float32)

    y = sin_pallas(x)
    jax.block_until_ready(y)

    # Correctness check against the pure-JAX reference.
    y_ref = jnp.sin(x)
    assert y.shape == x.shape and y.dtype == x.dtype
    assert jnp.allclose(y, y_ref, atol=1e-6, rtol=1e-6)

    print("KERNEL_OK")
</pallas_src>

<mosaic_0001>
module attributes {stable_mosaic.version = 11 : i64} {
  func.func @_sin_kernel(%arg0: i32, %arg1: memref<16x128xf32, #tpu.memory_space<vmem>>, %arg2: memref<16x128xf32, #tpu.memory_space<vmem>>) attributes {dimension_semantics = [#tpu.dimension_semantics<parallel>], iteration_bounds = array<i64: 1>, scalar_prefetch = 0 : i64, scratch_operands = 0 : i64, tpu.core_type = #tpu.core_type<tc>, window_params = [{transform_indices = @transform_0, window_bounds = array<i64: 16, 128>}, {transform_indices = @transform_1, window_bounds = array<i64: 16, 128>}]} {
    %c0 = arith.constant 0 : index
    %c0_0 = arith.constant 0 : index
    %0 = vector.load %arg1[%c0, %c0_0] : memref<16x128xf32, #tpu.memory_space<vmem>>, vector<16x128xf32>
    %1 = math.sin %0 : vector<16x128xf32>
    %c0_1 = arith.constant 0 : index
    %c0_2 = arith.constant 0 : index
    %2 = vector.load %arg2[%c0_1, %c0_2] : memref<16x128xf32, #tpu.memory_space<vmem>>, vector<16x128xf32>
    tpu.vector_store %arg2[%c0_1, %c0_2], %1 {strides = array<i32>} : memref<16x128xf32, #tpu.memory_space<vmem>>, vector<16x128xf32>,
    return
  }
  func.func @transform_0(%arg0: i32) -> (i32, i32) {
    %c0_i32 = arith.constant 0 : i32
    %c0_i32_0 = arith.constant 0 : i32
    return %arg0, %c0_i32 : i32, i32
  }
  func.func @transform_1(%arg0: i32) -> (i32, i32) {
    %c0_i32 = arith.constant 0 : i32
    %c0_i32_0 = arith.constant 0 : i32
    return %arg0, %c0_i32 : i32, i32
  }
}

</mosaic_0001>

<bundles_post_ra>
// kernel: sin_pallas.1
= control target key start
LH: loop header
LB: loop body
LE: loop exit
PB: predicated region body
PF: predicated region fallthrough
CT: control target
= control target key end

     0   :  { %v339_v23 = vmov 683565275   ;;  %v340_v25 = vmov 2475754826   ;;  %v341_v27 = vmov 2131351028   ;;  %s541_s0 = inlined_call_operand.vmem [shape: f32[16,128], index: 0, kind: input, shape index: {}]   ;;  %s542_s1 = inlined_call_operand.vmem [shape: f32[16,128], index: 1, kind: output, shape index: {}]  }
   0x1   :  { %v359_v0 = vld [vmem:[%s541_s0] sm:$0xff]  ;;  %v364_v1 = vld [vmem:[%s541_s0 + $0x8] sm:$0xff]  ;;  %v342_v29 = vmov 2102212464   ;;  %v343_v31 = vmov 920167782  }
   0x2   :  { %v10_v2 = vand.u32 2147483647, %v359_v0  ;;  %v13_v3 = vand.u32 2139095040, %v359_v0  ;;  %v165_v4 = vand.u32 2147483647, %v364_v1  ;;  %v168_v5 = vand.u32 2139095040, %v364_v1 }
   0x3   :  { %v344_v40 = vmov 1326507024  }
   0x4   :  { %v14_v6 = vshrl.u32 %v13_v3, 23  ;;  %v17_v7 = vand.u32 8388607, %v10_v2  ;;  %v169_v8 = vshrl.u32 %v168_v5, 23  ;;  %v172_v12 = vand.u32 8388607, %v165_v4 }
   0x6   :  { %v326_v9 = vadd.s32 4294967169, %v14_v6  ;;  %v18_v10 = vor.u32 8388608, %v17_v7  ;;  %v329_v11 = vadd.s32 4294967169, %v169_v8  ;;  %v173_v17 = vor.u32 8388608, %v172_v12 }
   0x8   :  { %v20_v13 = vadd.s32 1, %v326_v9  ;;  %v175_v14 = vadd.s32 1, %v329_v11  ;;  %v374_v16 = vshll.u32 %v18_v10, 8  ;;  %v384_v34 = vshll.u32 %v173_v17, 8 }
   0xa   :  { %vm21_vm0 = vcmp.gt.s32.totalorder %v20_v13, 0  ;;  %vm176_vm1 = vcmp.gt.s32.totalorder %v175_v14, 0  ;;  %v59_v33 = vand.u32 65535, %v374_v16  ;;  %v60_v38 = vshrl.u32 %v374_v16, 16 }
   0xb   :  { %v22_v15 = vsel %vm21_vm0, %v20_v13, 0  ;;  %v177_v19 = vsel %vm176_vm1, %v175_v14, 0 }
   0xc   :  { %v24_v18 = vand.u32 31, %v22_v15  ;;  %v376_v20 = vshrl.u32 %v22_v15, 5  ;;  %v378_v21 = vand.u32 31, %v177_v19  ;;  %v402_v51 = vshrl.u32 %v177_v19, 5 }
   0xe   :  { %v25_v22 = vsub.s32 32, %v24_v18  ;;  %v27_v24 = vshll.u32 %v339_v23, %v24_v18  ;;  %v30_v26 = vshll.u32 %v340_v25, %v24_v18  ;;  %v33_v28 = vshll.u32 %v341_v27, %v24_v18 }
   0xf   :  { %v36_v30 = vshll.u32 %v342_v29, %v24_v18  ;;  %v39_v32 = vshll.u32 %v343_v31, %v24_v18  ;;  %vm42_vm2 = vcmp.lt.s32.totalorder %v376_v20, 1  ;;  %vm45_vm3 = vcmp.lt.s32.totalorder %v376_v20, 4 }
  0x10   :  { %v28_v35 = vshrl.u32 %v340_v25, %v25_v22  ;;  %v31_v36 = vshrl.u32 %v341_v27, %v25_v22  ;;  %v34_v37 = vshrl.u32 %v342_v29, %v25_v22  ;;  %v37_v39 = vshrl.u32 %v343_v31, %v25_v22 }
  0x11   :  { %v40_v41 = vshrl.u32 %v344_v40, %v25_v22  ;;  %v393_v45 = vsub.s32 32, %v378_v21  ;;  %v26_v46 = vshrl.u32 %v339_v23, %v25_v22  ;;  %vm44_vm4 = vcmp.lt.s32.totalorder %v376_v20, 3 }
  0x12   :  { %v29_v42 = vor.u32 %v28_v35, %v27_v24  ;;  %v32_v43 = vor.u32 %v31_v36, %v30_v26  ;;  %v35_v44 = vor.u32 %v34_v37, %v33_v28  ;;  %v38_v47 = vor.u32 %v37_v39, %v36_v30 }
  0x13   :  { %v41_v48 = vor.u32 %v40_v41, %v39_v32  ;;  %vm43_vm5 = vcmp.lt.s32.totalorder %v376_v20, 2  ;;  %v182_v54 = vshll.u32 %v339_v23, %v378_v21  ;;  %v185_v55 = vshll.u32 %v340_v25, %v378_v21 }
  0x14   :  { %v50_v49 = vsel %vm42_vm2, %v29_v42, %v32_v43  ;;  %v54_v50 = vsel %vm42_vm2, %v32_v43, %v35_v44  ;;  %v51_v52 = vsel %vm45_vm3, %v38_v47, 920167782  ;;  %v47_v56 = vsel %vm45_vm3, %v35_v44, 2102212464 }
  0x15   :  { %v55_v53 = vsel %vm45_vm3, %v41_v48, 1326507024  ;;  %v52_v57 = vsel %vm44_vm4, %v35_v44, %v51_v52  ;;  %v183_v59 = vshrl.u32 %v340_v25, %v393_v45  ;;  %v46_v60 = vsel %vm42_vm2, %v26_v46, %v29_v42 }
  0x16   :  { %v56_v58 = vsel %vm44_vm4, %v38_v47, %v55_v53  ;;  %v53_v61 = vsel %vm43_vm5, %v50_v49, %v52_v57  ;;  %v186_v63 = vshrl.u32 %v341_v27, %v393_v45  ;;  %v48_v8 = vsel %vm44_vm4, %v32_v43, %v47_v56 }
  0x17   :  { %v57_v62 = vsel %vm43_vm5, %v54_v50, %v56_v58  ;;  %v83_v6 = vand.u32 65535, %v53_v61  ;;  %v84_v7 = vshrl.u32 %v53_v61, 16  ;;  %v427_v9 = vor.u32 %v183_v59, %v182_v54 }
  0x18   :  { %v61_v3 = vand.u32 65535, %v57_v62  ;;  %v62_v5 = vshrl.u32 %v57_v62, 16  ;;  %v429_v10 = vor.u32 %v186_v63, %v185_v55  ;;  %v188_v11 = vshll.u32 %v341_v27, %v378_v21 }
  0x19   :  { %v189_v15 = vshrl.u32 %v342_v29, %v393_v45  ;;  %v85_v18 = vmul.u32 %v83_v6, %v59_v33  ;;  %v86_v19 = vmul.u32 %v84_v7, %v59_v33  ;;  %v87_v22 = vmul.u32 %v83_v6, %v60_v38 }
  0x1a   :  { %v63_v12 = vmul.u32 %v61_v3, %v59_v33  ;;  %v64_v13 = vmul.u32 %v62_v5, %v59_v33  ;;  %v65_v14 = vmul.u32 %v61_v3, %v60_v38  ;;  %v66_v17 = vmul.u32 %v62_v5, %v60_v38 }
  0x1b   :  { %v88_v28 = vmul.u32 %v84_v7, %v60_v38  ;;  %v89_v32 = vshll.u32 %v86_v19, 16  ;;  %v90_v35 = vshrl.u32 %v86_v19, 16  ;;  %v91_v36 = vshll.u32 %v87_v22, 16 }
  0x1c   :  { %v67_v24 = vshll.u32 %v64_v13, 16  ;;  %v68_v25 = vshrl.u32 %v64_v13, 16  ;;  %v69_v26 = vshll.u32 %v65_v14, 16  ;;  %v70_v30 = vshrl.u32 %v65_v14, 16 }
  0x1d   :  { %v92_v37 = vshrl.u32 %v87_v22, 16  ;;  %v191_v39 = vshll.u32 %v342_v29, %v378_v21  ;;  %v345_v41 = vmov 0   ;;  %vm93_vm7 = vc.u32 %v85_v18, %v89_v32 }
  0x1e   :  { %vm71_vm6 = vc.u32 %v63_v12, %v67_v24  ;;  %v73_v27 = vadd.s32 %v67_v24, %v63_v12  ;;  %v95_v33 = vadd.s32 %v89_v32, %v85_v18  ;;  %v192_v43 = vshrl.u32 %v343_v31, %v393_v45 }
  0x1f   :  { %v72_v42 = vsel %vm71_vm6, 1, %v345_v41  ;;  %v94_v38 = vsel %vm93_vm7, 1, %v345_v41  ;;  %v194_v46 = vshll.u32 %v343_v31, %v378_v21  ;;  %v190_v29 = vor.u32 %v189_v15, %v188_v11 }
  0x20   :  { %v74_v44 = vadd.s32 %v72_v42, %v66_v17  ;;  %vm75_vm8 = vc.u32 %v73_v27, %v69_v26  ;;  %v96_v48 = vadd.s32 %v94_v38, %v88_v28  ;;  %vm97_vm9 = vc.u32 %v95_v33, %v91_v36 }
  0x21   :  { %v76_v47 = vsel %vm75_vm8, 1, %v345_v41  ;;  %v98_v50 = vsel %vm97_vm9, 1, %v345_v41  ;;  %v193_v52 = vor.u32 %v192_v43, %v191_v39  ;;  %v195_v53 = vshrl.u32 %v344_v40, %v393_v45 }
  0x22   :  { %v78_v49 = vadd.s32 %v76_v47, %v74_v44  ;;  %v446_v54 = vadd.s32 %v95_v33, %v91_v36  ;;  %v100_v55 = vadd.s32 %v98_v50, %v96_v48  ;;  %vm197_vm10 = vcmp.lt.s32.totalorder %v402_v51, 1 }
  0x23   :  { %vm199_vm11 = vcmp.lt.s32.totalorder %v402_v51, 3  ;;  %v196_v31 = vor.u32 %v195_v53, %v194_v46  ;;  %vm198_vm12 = vcmp.lt.s32.totalorder %v402_v51, 2  ;;  %vm200_vm13 = vcmp.lt.s32.totalorder %v402_v51, 4 }
  0x24   :  { %v79_v21 = vadd.s32 %v78_v49, %v68_v25  ;;  %v49_v56 = vsel %vm43_vm5, %v46_v60, %v48_v8  ;;  %v101_v57 = vadd.s32 %v100_v55, %v90_v35  ;;  %v205_v40 = vsel %vm197_vm10, %v427_v9, %v429_v10 }
  0x25   :  { %v206_v58 = vsel %vm200_vm13, %v193_v52, 920167782  ;;  %v209_v62 = vsel %vm197_vm10, %v429_v10, %v190_v29  ;;  %v214_v20 = vand.u32 65535, %v384_v34  ;;  %v210_v3 = vsel %vm200_vm13, %v196_v31, 1326507024 }
  0x26   :  { %v460_v59 = vadd.s32 %v79_v21, %v70_v30  ;;  %v207_v61 = vsel %vm199_vm11, %v190_v29, %v206_v58  ;;  %v102_v60 = vadd.s32 %v101_v57, %v92_v37  ;;  %v215_v5 = vshrl.u32 %v384_v34, 16 }
  0x27   :  { %v208_v63 = vsel %vm198_vm12, %v205_v40, %v207_v61  ;;  %v103_v6 = vmul.u32 %v374_v16, %v49_v56  ;;  %v211_v7 = vsel %vm199_vm11, %v193_v52, %v210_v3  ;;  %v181_v18 = vshrl.u32 %v339_v23, %v393_v45 }
  0x28   :  { %vm105_vm14 = vc.u32 %v460_v59, %v446_v54  ;;  %v238_v8 = vand.u32 65535, %v208_v63  ;;  %v106_v11 = vadd.s32 1, %v102_v60  ;;  %v212_v12 = vsel %vm198_vm12, %v209_v62, %v211_v7 }
  0x29   :  { %v239_v13 = vshrl.u32 %v208_v63, 16  ;;  %v216_v14 = vand.u32 65535, %v212_v12  ;;  %v217_v15 = vshrl.u32 %v212_v12, 16  ;;  %v202_v35 = vsel %vm200_vm13, %v190_v29, 2102212464 }
  0x2a   :  { %v107_v17 = vsel %vm105_vm14, %v106_v11, %v102_v60  ;;  %v242_v16 = vmul.u32 %v238_v8, %v215_v5  ;;  %v240_v26 = vmul.u32 %v238_v8, %v214_v20  ;;  %v201_v37 = vsel %vm197_vm10, %v181_v18, %v427_v9 }
  0x2b   :  { %v241_v19 = vmul.u32 %v239_v13, %v214_v20  ;;  %v108_v22 = vadd.s32 %v107_v17, %v103_v6  ;;  %v218_v24 = vmul.u32 %v216_v14, %v214_v20  ;;  %v219_v25 = vmul.u32 %v217_v15, %v214_v20 }
  0x2c   :  { %v220_v28 = vmul.u32 %v216_v14, %v215_v5  ;;  %v221_v36 = vmul.u32 %v217_v15, %v215_v5  ;;  %v243_v23 = vmul.u32 %v239_v13, %v215_v5  ;;  %v246_v45 = vshll.u32 %v242_v16, 16 }
  0x2d   :  { %v244_v30 = vshll.u32 %v241_v19, 16  ;;  %v109_v32 = vadd.s32 536870912, %v108_v22  ;;  %v222_v27 = vshll.u32 %v219_v25, 16  ;;  %v203_v43 = vsel %vm199_vm11, %v429_v10, %v202_v35 }
  0x2e   :  { %v224_v39 = vshll.u32 %v220_v28, 16  ;;  %v223_v9 = vshrl.u32 %v219_v25, 16  ;;  %v245_v49 = vshrl.u32 %v241_v19, 16  ;;  %v225_v53 = vshrl.u32 %v220_v28, 16 }
  0x2f   :  { %v487_v42 = vshrl.u32 %v109_v32, 30  ;;  %vm226_vm15 = vc.u32 %v218_v24, %v222_v27  ;;  %v228_v33 = vadd.s32 %v222_v27, %v218_v24  ;;  %vm248_vm0 = vc.u32 %v240_v26, %v244_v30 }
  0x30   :  { %v227_v44 = vsel %vm226_vm15, 1, %v345_v41  ;;  %v249_v38 = vsel %vm248_vm0, 1, %v345_v41  ;;  %v250_v46 = vadd.s32 %v244_v30, %v240_v26  ;;  %v247_v21 = vshrl.u32 %v242_v16, 16 }
  0x31   :  { %v111_v47 = vshll.u32 %v487_v42, 30  ;;  %v229_v48 = vadd.s32 %v227_v44, %v221_v36  ;;  %vm230_vm1 = vc.u32 %v228_v33, %v224_v39  ;;  %v251_v50 = vadd.s32 %v249_v38, %v243_v23 }
  0x32   :  { %v231_v29 = vsel %vm230_vm1, 1, %v345_v41  ;;  %vm252_vm2 = vc.u32 %v250_v46, %v246_v45  ;;  %v254_v40 = vadd.s32 %v250_v46, %v246_v45  ;;  %v204_v58 = vsel %vm198_vm12, %v201_v37, %v203_v43 }
  0x33   :  { %v112_v52 = vsub.s32 %v108_v22, %v111_v47  ;;  %v233_v55 = vadd.s32 %v231_v29, %v229_v48  ;;  %v253_v10 = vsel %vm252_vm2, 1, %v345_v41  ;;  %v258_v3 = vmul.u32 %v384_v34, %v204_v58 }
  0x34   :  { %v255_v31 = vadd.s32 %v253_v10, %v251_v50  ;;  %v104_v41 = vadd.s32 %v446_v54, %v460_v59  ;;  %v134_v28 = vsub.s32 4, %v487_v42  ;;  %vm12_vm7 = vcmp.lt.s32.totalorder %v359_v0, 0 }
  0x35   :  { %vm113_vm3 = vcmp.lt.s32.totalorder %v112_v52, 0  ;;  %v114_v56 = vsub.s32 0, %v112_v52  ;;  %v234_v57 = vadd.s32 %v233_v55, %v223_v9  ;;  %vm509_vm8 = vcmp.le.f32.partialorder %v10_v2, 0.7853982 }
  0x36   :  { %v256_v61 = vadd.s32 %v255_v31, %v245_v49  ;;  %v135_v37 = vsel %vm12_vm7, %v134_v28, %v487_v42  ;;  %vm167_vm11 = vcmp.lt.s32.totalorder %v364_v1, 0  ;;  %vm523_vm13 = vcmp.le.f32.partialorder %v165_v4, 0.7853982 }
  0x37   :  { %v115_v62 = vsel %vm113_vm3, %v114_v56, %v112_v52  ;;  %v235_v20 = vadd.s32 %v234_v57, %v225_v53  ;;  %v137_v43 = vsel %vm509_vm8, 0, %v135_v37  ;;  %vm153_vm15 = vweird.f32 %v359_v0 }
  0x38   :  { %v116_v60 = vclz %v115_v62  ;;  %v257_v63 = vadd.s32 %v256_v61, %v247_v21  ;;  %v154_v49 = vadd.s32 3, %v137_v43  ;;  %vm308_vm3 = vweird.f32 %v364_v1 }
  0x39   :  { %vm260_vm4 = vc.u32 %v235_v20, %v254_v40  ;;  %v259_v33 = vadd.s32 %v254_v40, %v235_v20 }
  0x3a   :  { %v327_v5 = vadd.s32 4294967294, %v116_v60  ;;  %v261_v6 = vadd.s32 1, %v257_v63  ;;  %v155_v56 = vand.u32 3, %v154_v49 }
  0x3c   :  { %vm328_vm5 = vcmp.lt.s32.totalorder %v327_v5, 0  ;;  %v262_v7 = vsel %vm260_vm4, %v261_v6, %v257_v63  ;;  %vm160_vm10 = vcmp.eq.s32.totalorder %v155_v56, 2  ;;  %vm157_vm12 = vcmp.eq.s32.totalorder %v155_v56, 0 }
  0x3d   :  { %v119_v8 = vsel %vm328_vm5, 0, %v327_v5  ;;  %v263_v11 = vadd.s32 %v262_v7, %v258_v3  ;;  %vm156_vm14 = vcmp.lt.s32.totalorder %v155_v56, 2 }
  0x3e   :  { %v120_v12 = vsub.s32 32, %v119_v8  ;;  %v121_v51 = vshll.u32 %v112_v52, %v119_v8  ;;  %v124_v13 = vsub.s32 4294967266, %v119_v8 }
  0x3f   :  { %v264_v14 = vadd.s32 536870912, %v263_v11 }
  0x40   :  { %v122_v15 = vshrl.u32 %v104_v41, %v120_v12  ;;  %v125_v17 = vadd.s32 127, %v124_v13 }
  0x41   :  { %v502_v18 = vshrl.u32 %v264_v14, 30 }
  0x42   :  { %v123_v19 = vor.u32 %v122_v15, %v121_v51  ;;  %v126_v34 = vshll.u32 %v125_v17, 23 }
  0x43   :  { %v266_v16 = vshll.u32 %v502_v18, 30  ;;  %v289_v6 = vsub.s32 4, %v502_v18 }
  0x44   :  { %v127_v22 = vor.u32 4788187, %v126_v34  ;;  %v130_v24 = vcvt.s32.f32 %v123_v19 }
  0x45   :  { %v267_v25 = vsub.s32 %v263_v11, %v266_v16  ;;  %v290_v13 = vsel %vm167_vm11, %v289_v6, %v502_v18 }
  0x46   :  { %v128_v54 = vand.u32 2147483647, %v127_v22  ;;  %v292_v19 = vsel %vm523_vm13, 0, %v290_v13 }
  0x47   :  { %vm268_vm6 = vcmp.lt.s32.totalorder %v267_v25, 0  ;;  %v269_v59 = vsub.s32 0, %v267_v25 }
  0x48   :  { %v131_v26 = vmul.f32 %v130_v24, %v128_v54  ;;  %v309_v24 = vadd.s32 3, %v292_v19 }
  0x49   :  { %v270_v30 = vsel %vm268_vm6, %v269_v59, %v267_v25 }
  0x4a   :  { %v132_v35 = vxor.u32 2147483648, %v131_v26  ;;  %v271_v36 = vclz %v270_v30 }
  0x4c   :  { %v133_v27 = vsel %vm12_vm7, %v132_v35, %v131_v26  ;;  %v330_v39 = vadd.s32 4294967294, %v271_v36  ;;  %v310_v26 = vand.u32 3, %v309_v24 }
  0x4d   :  { %v136_v23 = vsel %vm509_vm8, %v359_v0, %v133_v27 }
  0x4e   :  { %v138_v45 = vmul.f32 %v136_v23, %v136_v23  ;;  %vm331_vm9 = vcmp.lt.s32.totalorder %v330_v39, 0  ;;  %vm315_vm0 = vcmp.eq.s32.totalorder %v310_v26, 2  ;;  %vm312_vm1 = vcmp.eq.s32.totalorder %v310_v26, 0 }
  0x4f   :  { %v274_v2 = vsel %vm331_vm9, 0, %v330_v39  ;;  %vm311_vm2 = vcmp.lt.s32.totalorder %v310_v26, 2 }
  0x50   :  { %v139_v44 = vmul.f32 -0.001358992, %v138_v45  ;;  %v146_v38 = vmul.f32 -0.00019511016, %v138_v45  ;;  %v275_v46 = vsub.s32 32, %v274_v2  ;;  %v276_v47 = vshll.u32 %v267_v25, %v274_v2 }
  0x51   :  { %v279_v9 = vsub.s32 4294967266, %v274_v2 }
  0x52   :  { %v140_v48 = vadd.f32 0.041655596, %v139_v44  ;;  %v147_v29 = vadd.f32 0.008332121, %v146_v38  ;;  %v277_v42 = vshrl.u32 %v259_v33, %v275_v46 }
  0x53   :  { %v280_v50 = vadd.s32 127, %v279_v9 }
  0x54   :  { %v141_v52 = vmul.f32 %v140_v48, %v138_v45  ;;  %v148_v53 = vmul.f32 %v147_v29, %v138_v45  ;;  %v278_v55 = vor.u32 %v277_v42, %v276_v47 }
  0x55   :  { %v281_v10 = vshll.u32 %v280_v50, 23 }
  0x56   :  { %v142_v21 = vadd.f32 -0.4999988, %v141_v52  ;;  %v149_v31 = vadd.f32 -0.16666654, %v148_v53  ;;  %v285_v40 = vcvt.s32.f32 %v278_v55 }
  0x57   :  { %v282_v57 = vor.u32 4788187, %v281_v10 }
  0x58   :  { %v143_v58 = vmul.f32 %v142_v21, %v138_v45  ;;  %v150_v61 = vmul.f32 %v149_v31, %v138_v45 }
  0x59   :  { %v283_v62 = vand.u32 2147483647, %v282_v57 }
  0x5a   :  { %v144_v20 = vadd.f32 1.0, %v143_v58  ;;  %v151_v60 = vadd.f32 1.0, %v150_v61 }
  0x5b   :  { %v286_v63 = vmul.f32 %v285_v40, %v283_v62 }
  0x5c   :  { %v152_v3 = vmul.f32 %v151_v60, %v136_v23  ;;  %v161_v5 = vxor.u32 2147483648, %v144_v20 }
  0x5d   :  { %v287_v7 = vxor.u32 2147483648, %v286_v63 }
  0x5e   :  { %v158_v8 = vxor.u32 2147483648, %v152_v3  ;;  %v162_v11 = vsel %vm160_vm10, %v161_v5, %v152_v3 }
  0x5f   :  { %v288_v12 = vsel %vm167_vm11, %v287_v7, %v286_v63 }
  0x60   :  { %v159_v51 = vsel %vm157_vm12, %v144_v20, %v158_v8  ;;  %v291_v14 = vsel %vm523_vm13, %v364_v1, %v288_v12 }
  0x61   :  { %v163_v15 = vsel %vm156_vm14, %v159_v51, %v162_v11  ;;  %v293_v17 = vmul.f32 %v291_v14, %v291_v14 }
  0x62   :  { %v164_v4 = vsel %vm153_vm15, nan, %v163_v15 }
  0x63   :  { %v294_v34 = vmul.f32 -0.001358992, %v293_v17  ;;  %v301_v16 = vmul.f32 -0.00019511016, %v293_v17  ;;  %320 = vst [vmem:[%s542_s1] sm:$0xff] %v164_v4 }
  0x65   :  { %v295_v0 = vadd.f32 0.041655596, %v294_v34  ;;  %v302_v22 = vadd.f32 0.008332121, %v301_v16 }
  0x67   :  { %v296_v18 = vmul.f32 %v295_v0, %v293_v17  ;;  %v303_v25 = vmul.f32 %v302_v22, %v293_v17 }
  0x69   :  { %v297_v54 = vadd.f32 -0.4999988, %v296_v18  ;;  %v304_v59 = vadd.f32 -0.16666654, %v303_v25 }
  0x6b   :  { %v298_v28 = vmul.f32 %v297_v54, %v293_v17  ;;  %v305_v30 = vmul.f32 %v304_v59, %v293_v17 }
  0x6d   :  { %v299_v32 = vadd.f32 1.0, %v298_v28  ;;  %v306_v35 = vadd.f32 1.0, %v305_v30 }
  0x6f   :  { %v307_v36 = vmul.f32 %v306_v35, %v291_v14  ;;  %v316_v27 = vxor.u32 2147483648, %v299_v32 }
  0x71   :  { %v313_v37 = vxor.u32 2147483648, %v307_v36  ;;  %v317_v39 = vsel %vm315_vm0, %v316_v27, %v307_v36 }
  0x73   :  { %v314_v23 = vsel %vm312_vm1, %v299_v32, %v313_v37 }
  0x74   :  { %v318_v45 = vsel %vm311_vm2, %v314_v23, %v317_v39 }
  0x75   :  { %v319_v33 = vsel %vm308_vm3, nan, %v318_v45 }
  0x76   :  { %321 = vst [vmem:[%s542_s1 + $0x8] sm:$0xff] %v319_v33 }

</bundles_post_ra>
